<compile_context>
chip_gen: v6e
topology: v6e:2x2x1
jax: 0.10.0
libtpu: 0.0.40
codegen_flags: <defaults>
</compile_context>

<pallas_src>
import jax
import jax.numpy as jnp
import numpy as np
from jax.experimental import pallas as pl
from jax.experimental.pallas import tpu as pltpu


def _make_kernel(ncodebooks, compute_dtype, approx_reciprocal):
    def kernel(x_ref, cvk_ref, c2_ref, fused_ref, bias_ref, temp_ref, o_ref):
        x = x_ref[...]                       # (TB, in_features) f32
        temp = temp_ref[0]                   # softplus(logit) + 1, scalar (SMEM)
        v = cvk_ref.shape[1]                 # subvector length

        acc = None
        for c in range(ncodebooks):          # static, small loop
            x_c = x[:, c * v:(c + 1) * v]                        # (TB, v)
            cvk = cvk_ref[c]                                     # (v, k) = centroids_c^T
            c2 = c2_ref[c]                                       # (1, k) = ||centroid||^2

            # torch.cdist(p=2) via the norm expansion:
            #   dist[i,j] = sqrt(max(||x_i||^2 + ||c_j||^2 - 2 x_i.c_j, 0))
            x2 = jnp.sum(x_c * x_c, axis=-1, keepdims=True)      # (TB, 1)
            xc = jnp.dot(x_c.astype(compute_dtype), cvk,
                         preferred_element_type=jnp.float32)     # (TB, k)
            dist = jnp.sqrt(jnp.maximum(x2 + c2 - 2.0 * xc, 0.0))

            # softmax over the k codewords of -dist * temperature.
            logits = -dist * temp
            logits = logits - jnp.max(logits, axis=-1, keepdims=True)
            p = jnp.exp(logits)
            s = jnp.sum(p, axis=-1, keepdims=True)
            if approx_reciprocal:
                attn = p * pl.reciprocal(s, approx=True)
            else:
                attn = p / s                                     # (TB, k)

            # attn_c @ (centroids_c @ W_c^T): lane-dense (TB, k) @ (k, out_pad).
            term = jnp.dot(attn.astype(compute_dtype), fused_ref[c],
                           preferred_element_type=jnp.float32)   # (TB, out_pad)
            acc = term if acc is None else acc + term

        o_ref[...] = acc + bias_ref[...]

    return kernel


def triven_linear(x, centroids, weight, bias, inverse_temperature_logit,
                  *, block_b=512, compute_dtype=jnp.float32,
                  approx_reciprocal=False):
    """x: (b, n, in_features) f32 -> (b, n, out_features) f32.

    compute_dtype=jnp.bfloat16 may be used on v6e/v7x for MXU operands
    (f32 accumulation kept); approx_reciprocal=True moves the softmax
    normalization onto the EUP. Both default off so the result matches the
    exact f32 reference to 1e-4.
    """
    b, n, in_features = x.shape
    ncodebooks, k, v = centroids.shape
    out_features = weight.shape[0]
    assert in_features == ncodebooks * v
    B = b * n

    # Contiguous (B, in_features) view of the activations -- no HBM transpose.
    x2d = x.reshape(B, in_features)

    # Batch tile: constant VMEM footprint regardless of batch*seq.
    TB = min(B, block_b)
    grid_b = pl.cdiv(B, TB)

    # Lane-dense output: pad out_features up to a multiple of 128.
    out_pad = ((out_features + 127) // 128) * 128

    # Host-side parameter-only precomputes (tiny relative to the main matmul):
    cvk = jnp.swapaxes(centroids, 1, 2).astype(compute_dtype)        # (c, v, k)
    c2 = jnp.sum(centroids * centroids, axis=-1)[:, None, :]         # (c, 1, k) f32
    wT = jnp.swapaxes(weight, 0, 1)                                  # (in, out)
    wT = jnp.pad(wT, ((0, 0), (0, out_pad - out_features)))          # (in, out_pad)
    fused = jnp.einsum('ckv,cvo->cko', centroids,
                       wT.reshape(ncodebooks, v, out_pad)
                       ).astype(compute_dtype)                       # (c, k, out_pad)
    if bias is None:
        bias_p = jnp.zeros((1, out_pad), jnp.float32)
    else:
        bias_p = jnp.pad(bias.reshape(1, out_features),
                         ((0, 0), (0, out_pad - out_features))).astype(jnp.float32)
    temp = (jax.nn.softplus(inverse_temperature_logit) + 1.0
            ).reshape(1).astype(jnp.float32)

    kernel = _make_kernel(ncodebooks, compute_dtype, approx_reciprocal)

    out = pl.pallas_call(
        kernel,
        out_shape=jax.ShapeDtypeStruct((B, out_pad), jnp.float32),
        grid_spec=pltpu.PrefetchScalarGridSpec(
            num_scalar_prefetch=0,
            grid=(grid_b,),
            in_specs=[
                pl.BlockSpec((TB, in_features), lambda i: (i, 0)),            # x tile
                pl.BlockSpec((ncodebooks, v, k), lambda i: (0, 0, 0)),        # centroids^T
                pl.BlockSpec((ncodebooks, 1, k), lambda i: (0, 0, 0)),        # ||centroid||^2
                pl.BlockSpec((ncodebooks, k, out_pad), lambda i: (0, 0, 0)),  # centroids @ W^T
                pl.BlockSpec((1, out_pad), lambda i: (0, 0)),                 # bias (padded)
                pl.BlockSpec(memory_space=pltpu.MemorySpace.SMEM),            # temperature
            ],
            out_specs=pl.BlockSpec((TB, out_pad), lambda i: (i, 0)),
        ),
        compiler_params=pltpu.CompilerParams(
            dimension_semantics=("parallel",)),
    )(x2d, cvk, c2, fused, bias_p, temp)

    return out[:, :out_features].reshape(b, n, out_features)


def _reference(x, centroids, weight, bias, inverse_temperature_logit):
    """Pure-JAX reference mirroring the PyTorch forward."""
    b, n, in_features = x.shape
    ncodebooks, k, v = centroids.shape
    B = b * n
    xr = x.reshape(B, ncodebooks, v).transpose(1, 0, 2)               # (c, B, v)
    diff = xr[:, :, None, :] - centroids[:, None, :, :]               # (c, B, k, v)
    dist = jnp.sqrt(jnp.sum(diff * diff, axis=-1))                    # (c, B, k)
    temp = jax.nn.softplus(inverse_temperature_logit) + 1.0
    attn = jax.nn.softmax(-dist * temp, axis=-1)
    a = jnp.einsum('cbk,ckv->cbv', attn, centroids)                   # (c, B, v)
    xflat = a.transpose(1, 0, 2).reshape(B, in_features)
    y = xflat @ weight.T
    if bias is not None:
        y = y + bias
    return y.reshape(b, n, -1)


if __name__ == "__main__":
    # Small shapes consistent with the module's constraints.
    ncodebooks = 4
    in_features = 32
    out_features = 32
    kcodes = 16
    subvec_len = in_features // ncodebooks
    b, n = 2, 8

    key = jax.random.PRNGKey(0)
    k1, k2, k3, k4, k5 = jax.random.split(key, 5)
    centroids = jax.random.normal(k1, (ncodebooks, kcodes, subvec_len), jnp.float32)
    weight = jax.random.normal(k2, (out_features, in_features), jnp.float32)
    inverse_temperature_logit = jax.random.normal(k3, (1,), jnp.float32)
    bias = jax.random.normal(k4, (out_features,), jnp.float32)
    x = jax.random.normal(k5, (b, n, in_features), jnp.float32)

    y = triven_linear(x, centroids, weight, bias, inverse_temperature_logit)
    y = jax.block_until_ready(y)

    y_ref = _reference(x, centroids, weight, bias, inverse_temperature_logit)
    np.testing.assert_allclose(np.asarray(y), np.asarray(y_ref), rtol=1e-4, atol=1e-4)

    print("KERNEL_OK")
</pallas_src>

<mosaic_0001>
module attributes {stable_mosaic.version = 11 : i64} {
  func.func @kernel(%arg0: i32, %arg1: memref<16x32xf32, #tpu.memory_space<vmem>>, %arg2: memref<4x8x16xf32, #tpu.memory_space<vmem>>, %arg3: memref<4x1x16xf32, #tpu.memory_space<vmem>>, %arg4: memref<4x16x128xf32, #tpu.memory_space<vmem>>, %arg5: memref<1x128xf32, #tpu.memory_space<vmem>>, %arg6: memref<1xf32, #tpu.memory_space<smem>>, %arg7: memref<16x128xf32, #tpu.memory_space<vmem>>) attributes {dimension_semantics = [#tpu.dimension_semantics<parallel>], iteration_bounds = array<i64: 1>, scalar_prefetch = 0 : i64, scratch_operands = 0 : i64, tpu.core_type = #tpu.core_type<tc>, window_params = [{transform_indices = @transform_0, window_bounds = array<i64: 16, 32>}, {pipeline_mode = #tpu.pipeline_mode<synchronous>, transform_indices = @transform_1, window_bounds = array<i64: 4, 8, 16>}, {pipeline_mode = #tpu.pipeline_mode<synchronous>, transform_indices = @transform_2, window_bounds = array<i64: 4, 1, 16>}, {pipeline_mode = #tpu.pipeline_mode<synchronous>, transform_indices = @transform_3, window_bounds = array<i64: 4, 16, 128>}, {pipeline_mode = #tpu.pipeline_mode<synchronous>, transform_indices = @transform_4, window_bounds = array<i64: 1, 128>}, {transform_indices = @transform_5, window_bounds = array<i64: 1>}, {transform_indices = @transform_6, window_bounds = array<i64: 16, 128>}]} {
    %c0 = arith.constant 0 : index
    %c0_0 = arith.constant 0 : index
    %0 = vector.load %arg1[%c0, %c0_0] : memref<16x32xf32, #tpu.memory_space<vmem>>, vector<16x32xf32>
    %c0_1 = arith.constant 0 : index
    %1 = memref.load %arg6[%c0_1] : memref<1xf32, #tpu.memory_space<smem>>
    %2 = vector.extract_strided_slice %0 {offsets = [0, 0], sizes = [16, 8], strides = [1, 1]} : vector<16x32xf32> to vector<16x8xf32>
    %c0_2 = arith.constant 0 : index
    %c0_3 = arith.constant 0 : index
    %c0_4 = arith.constant 0 : index
    %3 = vector.load %arg2[%c0_2, %c0_3, %c0_4] : memref<4x8x16xf32, #tpu.memory_space<vmem>>, vector<1x8x16xf32>
    %4 = vector.shape_cast %3 : vector<1x8x16xf32> to vector<8x16xf32>
    %c0_5 = arith.constant 0 : index
    %c0_6 = arith.constant 0 : index
    %c0_7 = arith.constant 0 : index
    %5 = vector.load %arg3[%c0_5, %c0_6, %c0_7] : memref<4x1x16xf32, #tpu.memory_space<vmem>>, vector<1x1x16xf32>
    %6 = vector.shape_cast %5 : vector<1x1x16xf32> to vector<1x16xf32>
    %7 = arith.mulf %2, %2 : vector<16x8xf32>
    %cst = arith.constant dense<0.000000e+00> : vector<16xf32>
    %8 = vector.multi_reduction <add>, %7, %cst [1] : vector<16x8xf32> to vector<16xf32>
    %9 = vector.shape_cast %8 : vector<16xf32> to vector<16x1xf32>
    %cst_8 = arith.constant dense<0.000000e+00> : vector<16x16xf32>
    %10 = tpu.matmul %2, %4, %cst_8 {dimension_numbers = #tpu.dot_dimension_numbers<[1], [0], [0], [1], [0, 0, 1, 1], [], []>} : vector<16x8xf32>, vector<8x16xf32>, vector<16x16xf32> -> vector<16x16xf32>
    %11 = vector.broadcast %9 : vector<16x1xf32> to vector<16x16xf32>
    %12 = vector.broadcast %6 : vector<1x16xf32> to vector<16x16xf32>
    %13 = arith.addf %11, %12 : vector<16x16xf32>
    %cst_9 = arith.constant 2.000000e+00 : f32
    %14 = vector.broadcast %cst_9 : f32 to vector<16x16xf32>
    %15 = arith.mulf %14, %10 : vector<16x16xf32>
    %16 = arith.subf %13, %15 : vector<16x16xf32>
    %cst_10 = arith.constant 0.000000e+00 : f32
    %17 = vector.broadcast %cst_10 : f32 to vector<16x16xf32>
    %18 = arith.maximumf %16, %17 : vector<16x16xf32>
    %19 = math.sqrt %18 : vector<16x16xf32>
    %cst_11 = arith.constant 0.000000e+00 : f32
    %20 = vector.broadcast %cst_11 : f32 to vector<16x16xf32>
    %21 = arith.subf %20, %19 : vector<16x16xf32>
    %22 = vector.broadcast %1 : f32 to vector<16x16xf32>
    %23 = arith.mulf %21, %22 : vector<16x16xf32>
    %cst_12 = arith.constant dense<0xFF800000> : vector<16xf32>
    %24 = vector.multi_reduction <maximumf>, %23, %cst_12 [1] : vector<16x16xf32> to vector<16xf32>
    %25 = vector.shape_cast %24 : vector<16xf32> to vector<16x1xf32>
    %26 = vector.broadcast %25 : vector<16x1xf32> to vector<16x16xf32>
    %27 = arith.subf %23, %26 : vector<16x16xf32>
    %28 = math.exp %27 : vector<16x16xf32>
    %cst_13 = arith.constant dense<0.000000e+00> : vector<16xf32>
    %29 = vector.multi_reduction <add>, %28, %cst_13 [1] : vector<16x16xf32> to vector<16xf32>
    %30 = vector.shape_cast %29 : vector<16xf32> to vector<16x1xf32>
    %31 = vector.broadcast %30 : vector<16x1xf32> to vector<16x16xf32>
    %32 = arith.divf %28, %31 : vector<16x16xf32>
    %c0_14 = arith.constant 0 : index
    %c0_15 = arith.constant 0 : index
    %c0_16 = arith.constant 0 : index
    %33 = vector.load %arg4[%c0_14, %c0_15, %c0_16] : memref<4x16x128xf32, #tpu.memory_space<vmem>>, vector<1x16x128xf32>
    %34 = vector.shape_cast %33 : vector<1x16x128xf32> to vector<16x128xf32>
    %cst_17 = arith.constant dense<0.000000e+00> : vector<16x128xf32>
    %35 = tpu.matmul %32, %34, %cst_17 {dimension_numbers = #tpu.dot_dimension_numbers<[1], [0], [0], [1], [0, 0, 1, 1], [], []>} : vector<16x16xf32>, vector<16x128xf32>, vector<16x128xf32> -> vector<16x128xf32>
    %36 = vector.extract_strided_slice %0 {offsets = [0, 8], sizes = [16, 8], strides = [1, 1]} : vector<16x32xf32> to vector<16x8xf32>
    %c1 = arith.constant 1 : index
    %c0_18 = arith.constant 0 : index
    %c0_19 = arith.constant 0 : index
    %37 = vector.load %arg2[%c1, %c0_18, %c0_19] : memref<4x8x16xf32, #tpu.memory_space<vmem>>, vector<1x8x16xf32>
    %38 = vector.shape_cast %37 : vector<1x8x16xf32> to vector<8x16xf32>
    %c1_20 = arith.constant 1 : index
    %c0_21 = arith.constant 0 : index
    %c0_22 = arith.constant 0 : index
    %39 = vector.load %arg3[%c1_20, %c0_21, %c0_22] : memref<4x1x16xf32, #tpu.memory_space<vmem>>, vector<1x1x16xf32>
    %40 = vector.shape_cast %39 : vector<1x1x16xf32> to vector<1x16xf32>
    %41 = arith.mulf %36, %36 : vector<16x8xf32>
    %cst_23 = arith.constant dense<0.000000e+00> : vector<16xf32>
    %42 = vector.multi_reduction <add>, %41, %cst_23 [1] : vector<16x8xf32> to vector<16xf32>
    %43 = vector.shape_cast %42 : vector<16xf32> to vector<16x1xf32>
    %cst_24 = arith.constant dense<0.000000e+00> : vector<16x16xf32>
    %44 = tpu.matmul %36, %38, %cst_24 {dimension_numbers = #tpu.dot_dimension_numbers<[1], [0], [0], [1], [0, 0, 1, 1], [], []>} : vector<16x8xf32>, vector<8x16xf32>, vector<16x16xf32> -> vector<16x16xf32>
    %45 = vector.broadcast %43 : vector<16x1xf32> to vector<16x16xf32>
    %46 = vector.broadcast %40 : vector<1x16xf32> to vector<16x16xf32>
    %47 = arith.addf %45, %46 : vector<16x16xf32>
    %cst_25 = arith.constant 2.000000e+00 : f32
    %48 = vector.broadcast %cst_25 : f32 to vector<16x16xf32>
    %49 = arith.mulf %48, %44 : vector<16x16xf32>
    %50 = arith.subf %47, %49 : vector<16x16xf32>
    %cst_26 = arith.constant 0.000000e+00 : f32
    %51 = vector.broadcast %cst_26 : f32 to vector<16x16xf32>
    %52 = arith.maximumf %50, %51 : vector<16x16xf32>
    %53 = math.sqrt %52 : vector<16x16xf32>
    %cst_27 = arith.constant 0.000000e+00 : f32
    %54 = vector.broadcast %cst_27 : f32 to vector<16x16xf32>
    %55 = arith.subf %54, %53 : vector<16x16xf32>
    %56 = vector.broadcast %1 : f32 to vector<16x16xf32>
    %57 = arith.mulf %55, %56 : vector<16x16xf32>
    %cst_28 = arith.constant dense<0xFF800000> : vector<16xf32>
    %58 = vector.multi_reduction <maximumf>, %57, %cst_28 [1] : vector<16x16xf32> to vector<16xf32>
    %59 = vector.shape_cast %58 : vector<16xf32> to vector<16x1xf32>
    %60 = vector.broadcast %59 : vector<16x1xf32> to vector<16x16xf32>
    %61 = arith.subf %57, %60 : vector<16x16xf32>
    %62 = math.exp %61 : vector<16x16xf32>
    %cst_29 = arith.constant dense<0.000000e+00> : vector<16xf32>
    %63 = vector.multi_reduction <add>, %62, %cst_29 [1] : vector<16x16xf32> to vector<16xf32>
    %64 = vector.shape_cast %63 : vector<16xf32> to vector<16x1xf32>
    %65 = vector.broadcast %64 : vector<16x1xf32> to vector<16x16xf32>
    %66 = arith.divf %62, %65 : vector<16x16xf32>
    %c1_30 = arith.constant 1 : index
    %c0_31 = arith.constant 0 : index
    %c0_32 = arith.constant 0 : index
    %67 = vector.load %arg4[%c1_30, %c0_31, %c0_32] : memref<4x16x128xf32, #tpu.memory_space<vmem>>, vector<1x16x128xf32>
    %68 = vector.shape_cast %67 : vector<1x16x128xf32> to vector<16x128xf32>
    %cst_33 = arith.constant dense<0.000000e+00> : vector<16x128xf32>
    %69 = tpu.matmul %66, %68, %cst_33 {dimension_numbers = #tpu.dot_dimension_numbers<[1], [0], [0], [1], [0, 0, 1, 1], [], []>} : vector<16x16xf32>, vector<16x128xf32>, vector<16x128xf32> -> vector<16x128xf32>
    %70 = arith.addf %35, %69 : vector<16x128xf32>
    %71 = vector.extract_strided_slice %0 {offsets = [0, 16], sizes = [16, 8], strides = [1, 1]} : vector<16x32xf32> to vector<16x8xf32>
    %c2 = arith.constant 2 : index
    %c0_34 = arith.constant 0 : index
    %c0_35 = arith.constant 0 : index
    %72 = vector.load %arg2[%c2, %c0_34, %c0_35] : memref<4x8x16xf32, #tpu.memory_space<vmem>>, vector<1x8x16xf32>
    %73 = vector.shape_cast %72 : vector<1x8x16xf32> to vector<8x16xf32>
    %c2_36 = arith.constant 2 : index
    %c0_37 = arith.constant 0 : index
    %c0_38 = arith.constant 0 : index
    %74 = vector.load %arg3[%c2_36, %c0_37, %c0_38] : memref<4x1x16xf32, #tpu.memory_space<vmem>>, vector<1x1x16xf32>
    %75 = vector.shape_cast %74 : vector<1x1x16xf32> to vector<1x16xf32>
    %76 = arith.mulf %71, %71 : vector<16x8xf32>
    %cst_39 = arith.constant dense<0.000000e+00> : vector<16xf32>
    %77 = vector.multi_reduction <add>, %76, %cst_39 [1] : vector<16x8xf32> to vector<16xf32>
    %78 = vector.shape_cast %77 : vector<16xf32> to vector<16x1xf32>
    %cst_40 = arith.constant dense<0.000000e+00> : vector<16x16xf32>
    %79 = tpu.matmul %71, %73, %cst_40 {dimension_numbers = #tpu.dot_dimension_numbers<[1], [0], [0], [1], [0, 0, 1, 1], [], []>} : vector<16x8xf32>, vector<8x16xf32>, vector<16x16xf32> -> vector<16x16xf32>
    %80 = vector.broadcast %78 : vector<16x1xf32> to vector<16x16xf32>
    %81 = vector.broadcast %75 : vector<1x16xf32> to vector<16x16xf32>
    %82 = arith.addf %80, %81 : vector<16x16xf32>
    %cst_41 = arith.constant 2.000000e+00 : f32
    %83 = vector.broadcast %cst_41 : f32 to vector<16x16xf32>
    %84 = arith.mulf %83, %79 : vector<16x16xf32>
    %85 = arith.subf %82, %84 : vector<16x16xf32>
    %cst_42 = arith.constant 0.000000e+00 : f32
    %86 = vector.broadcast %cst_42 : f32 to vector<16x16xf32>
    %87 = arith.maximumf %85, %86 : vector<16x16xf32>
    %88 = math.sqrt %87 : vector<16x16xf32>
    %cst_43 = arith.constant 0.000000e+00 : f32
    %89 = vector.broadcast %cst_43 : f32 to vector<16x16xf32>
    %90 = arith.subf %89, %88 : vector<16x16xf32>
    %91 = vector.broadcast %1 : f32 to vector<16x16xf32>
    %92 = arith.mulf %90, %91 : vector<16x16xf32>
    %cst_44 = arith.constant dense<0xFF800000> : vector<16xf32>
    %93 = vector.multi_reduction <maximumf>, %92, %cst_44 [1] : vector<16x16xf32> to vector<16xf32>
    %94 = vector.shape_cast %93 : vector<16xf32> to vector<16x1xf32>
    %95 = vector.broadcast %94 : vector<16x1xf32> to vector<16x16xf32>
    %96 = arith.subf %92, %95 : vector<16x16xf32>
    %97 = math.exp %96 : vector<16x16xf32>
    %cst_45 = arith.constant dense<0.000000e+00> : vector<16xf32>
    %98 = vector.multi_reduction <add>, %97, %cst_45 [1] : vector<16x16xf32> to vector<16xf32>
    %99 = vector.shape_cast %98 : vector<16xf32> to vector<16x1xf32>
    %100 = vector.broadcast %99 : vector<16x1xf32> to vector<16x16xf32>
    %101 = arith.divf %97, %100 : vector<16x16xf32>
    %c2_46 = arith.constant 2 : index
    %c0_47 = arith.constant 0 : index
    %c0_48 = arith.constant 0 : index
    %102 = vector.load %arg4[%c2_46, %c0_47, %c0_48] : memref<4x16x128xf32, #tpu.memory_space<vmem>>, vector<1x16x128xf32>
    %103 = vector.shape_cast %102 : vector<1x16x128xf32> to vector<16x128xf32>
    %cst_49 = arith.constant dense<0.000000e+00> : vector<16x128xf32>
    %104 = tpu.matmul %101, %103, %cst_49 {dimension_numbers = #tpu.dot_dimension_numbers<[1], [0], [0], [1], [0, 0, 1, 1], [], []>} : vector<16x16xf32>, vector<16x128xf32>, vector<16x128xf32> -> vector<16x128xf32>
    %105 = arith.addf %70, %104 : vector<16x128xf32>
    %106 = vector.extract_strided_slice %0 {offsets = [0, 24], sizes = [16, 8], strides = [1, 1]} : vector<16x32xf32> to vector<16x8xf32>
    %c3 = arith.constant 3 : index
    %c0_50 = arith.constant 0 : index
    %c0_51 = arith.constant 0 : index
    %107 = vector.load %arg2[%c3, %c0_50, %c0_51] : memref<4x8x16xf32, #tpu.memory_space<vmem>>, vector<1x8x16xf32>
    %108 = vector.shape_cast %107 : vector<1x8x16xf32> to vector<8x16xf32>
    %c3_52 = arith.constant 3 : index
    %c0_53 = arith.constant 0 : index
    %c0_54 = arith.constant 0 : index
    %109 = vector.load %arg3[%c3_52, %c0_53, %c0_54] : memref<4x1x16xf32, #tpu.memory_space<vmem>>, vector<1x1x16xf32>
    %110 = vector.shape_cast %109 : vector<1x1x16xf32> to vector<1x16xf32>
    %111 = arith.mulf %106, %106 : vector<16x8xf32>
    %cst_55 = arith.constant dense<0.000000e+00> : vector<16xf32>
    %112 = vector.multi_reduction <add>, %111, %cst_55 [1] : vector<16x8xf32> to vector<16xf32>
    %113 = vector.shape_cast %112 : vector<16xf32> to vector<16x1xf32>
    %cst_56 = arith.constant dense<0.000000e+00> : vector<16x16xf32>
    %114 = tpu.matmul %106, %108, %cst_56 {dimension_numbers = #tpu.dot_dimension_numbers<[1], [0], [0], [1], [0, 0, 1, 1], [], []>} : vector<16x8xf32>, vector<8x16xf32>, vector<16x16xf32> -> vector<16x16xf32>
    %115 = vector.broadcast %113 : vector<16x1xf32> to vector<16x16xf32>
    %116 = vector.broadcast %110 : vector<1x16xf32> to vector<16x16xf32>
    %117 = arith.addf %115, %116 : vector<16x16xf32>
    %cst_57 = arith.constant 2.000000e+00 : f32
    %118 = vector.broadcast %cst_57 : f32 to vector<16x16xf32>
    %119 = arith.mulf %118, %114 : vector<16x16xf32>
    %120 = arith.subf %117, %119 : vector<16x16xf32>
    %cst_58 = arith.constant 0.000000e+00 : f32
    %121 = vector.broadcast %cst_58 : f32 to vector<16x16xf32>
    %122 = arith.maximumf %120, %121 : vector<16x16xf32>
    %123 = math.sqrt %122 : vector<16x16xf32>
    %cst_59 = arith.constant 0.000000e+00 : f32
    %124 = vector.broadcast %cst_59 : f32 to vector<16x16xf32>
    %125 = arith.subf %124, %123 : vector<16x16xf32>
    %126 = vector.broadcast %1 : f32 to vector<16x16xf32>
    %127 = arith.mulf %125, %126 : vector<16x16xf32>
    %cst_60 = arith.constant dense<0xFF800000> : vector<16xf32>
    %128 = vector.multi_reduction <maximumf>, %127, %cst_60 [1] : vector<16x16xf32> to vector<16xf32>
    %129 = vector.shape_cast %128 : vector<16xf32> to vector<16x1xf32>
    %130 = vector.broadcast %129 : vector<16x1xf32> to vector<16x16xf32>
    %131 = arith.subf %127, %130 : vector<16x16xf32>
    %132 = math.exp %131 : vector<16x16xf32>
    %cst_61 = arith.constant dense<0.000000e+00> : vector<16xf32>
    %133 = vector.multi_reduction <add>, %132, %cst_61 [1] : vector<16x16xf32> to vector<16xf32>
    %134 = vector.shape_cast %133 : vector<16xf32> to vector<16x1xf32>
    %135 = vector.broadcast %134 : vector<16x1xf32> to vector<16x16xf32>
    %136 = arith.divf %132, %135 : vector<16x16xf32>
    %c3_62 = arith.constant 3 : index
    %c0_63 = arith.constant 0 : index
    %c0_64 = arith.constant 0 : index
    %137 = vector.load %arg4[%c3_62, %c0_63, %c0_64] : memref<4x16x128xf32, #tpu.memory_space<vmem>>, vector<1x16x128xf32>
    %138 = vector.shape_cast %137 : vector<1x16x128xf32> to vector<16x128xf32>
    %cst_65 = arith.constant dense<0.000000e+00> : vector<16x128xf32>
    %139 = tpu.matmul %136, %138, %cst_65 {dimension_numbers = #tpu.dot_dimension_numbers<[1], [0], [0], [1], [0, 0, 1, 1], [], []>} : vector<16x16xf32>, vector<16x128xf32>, vector<16x128xf32> -> vector<16x128xf32>
    %140 = arith.addf %105, %139 : vector<16x128xf32>
    %c0_66 = arith.constant 0 : index
    %c0_67 = arith.constant 0 : index
    %141 = vector.load %arg5[%c0_66, %c0_67] : memref<1x128xf32, #tpu.memory_space<vmem>>, vector<1x128xf32>
    %142 = vector.broadcast %141 : vector<1x128xf32> to vector<16x128xf32>
    %143 = arith.addf %140, %142 : vector<16x128xf32>
    %c0_68 = arith.constant 0 : index
    %c0_69 = arith.constant 0 : index
    %144 = vector.load %arg7[%c0_68, %c0_69] : memref<16x128xf32, #tpu.memory_space<vmem>>, vector<16x128xf32>
    tpu.vector_store %arg7[%c0_68, %c0_69], %143 {strides = array<i32>} : memref<16x128xf32, #tpu.memory_space<vmem>>, vector<16x128xf32>,
    return
  }
  func.func @transform_0(%arg0: i32) -> (i32, i32) {
    %c0_i32 = arith.constant 0 : i32
    %c0_i32_0 = arith.constant 0 : i32
    return %arg0, %c0_i32 : i32, i32
  }
  func.func @transform_1(%arg0: i32) -> (i32, i32, i32) {
    %c0_i32 = arith.constant 0 : i32
    %c0_i32_0 = arith.constant 0 : i32
    %c0_i32_1 = arith.constant 0 : i32
    %c0_i32_2 = arith.constant 0 : i32
    return %c0_i32, %c0_i32_0, %c0_i32_1 : i32, i32, i32
  }
  func.func @transform_2(%arg0: i32) -> (i32, i32, i32) {
    %c0_i32 = arith.constant 0 : i32
    %c0_i32_0 = arith.constant 0 : i32
    %c0_i32_1 = arith.constant 0 : i32
    %c0_i32_2 = arith.constant 0 : i32
    return %c0_i32, %c0_i32_0, %c0_i32_1 : i32, i32, i32
  }
  func.func @transform_3(%arg0: i32) -> (i32, i32, i32) {
    %c0_i32 = arith.constant 0 : i32
    %c0_i32_0 = arith.constant 0 : i32
    %c0_i32_1 = arith.constant 0 : i32
    %c0_i32_2 = arith.constant 0 : i32
    return %c0_i32, %c0_i32_0, %c0_i32_1 : i32, i32, i32
  }
  func.func @transform_4(%arg0: i32) -> (i32, i32) {
    %c0_i32 = arith.constant 0 : i32
    %c0_i32_0 = arith.constant 0 : i32
    %c0_i32_1 = arith.constant 0 : i32
    return %c0_i32, %c0_i32_0 : i32, i32
  }
  func.func @transform_5(%arg0: i32) -> i32 {
    %c0_i32 = arith.constant 0 : i32
    %c0_i32_0 = arith.constant 0 : i32
    return %c0_i32 : i32
  }
  func.func @transform_6(%arg0: i32) -> (i32, i32) {
    %c0_i32 = arith.constant 0 : i32
    %c0_i32_0 = arith.constant 0 : i32
    return %arg0, %c0_i32 : i32, i32
  }
}

</mosaic_0001>

<bundles_post_ra>
// kernel: tpu_custom_call.1
= control target key start
LH: loop header
LB: loop body
LE: loop exit
PB: predicated region body
PF: predicated region fallthrough
CT: control target
= control target key end

     0   :  { %12 = vsyncpa [#allocation4], 0  ;;  %s1463_s0 = inlined_call_operand.hbm [shape: f32[16,32], index: 0, kind: input, shape index: {}]   ;;  %s1464_s1 = inlined_call_operand.hbm [shape: f32[4,8,16], index: 1, kind: input, shape index: {}]   ;;  %s1465_s2 = inlined_call_operand.vmem [shape: f32[4,1,16], index: 2, kind: input, shape index: {}]   ;;  %s1466_s3 = inlined_call_operand.hbm [shape: f32[4,16,128], index: 3, kind: input, shape index: {}]   ;;  %s1467_s4 = inlined_call_operand.vmem [shape: f32[1,128], index: 4, kind: input, shape index: {}]   ;;  %s1468_s5 = inlined_call_operand.<no memory space> [shape: f32[1], index: 5, kind: input, shape index: {}]   ;;  %s1469_s6 = inlined_call_operand.hbm [shape: f32[16,128], index: 6, kind: output, shape index: {}]  }
   0x1   :  { %13 = vsyncpa [#allocation7], 0 }
   0x2   :  { %14 = vsyncpa [#allocation5], 0  ;;  %s1289_s21 = smov [#allocation6]   ;;  %s1290_s23 = smov [#allocation3]  }
   0x3   :  { %s32_s22 = sshll.u32 %s1289_s21, 4  ;;  %s20_s24 = sshll.u32 %s1290_s23, 4  ;;  %s33_s22 = int_to_ptr.vmem [resolvable:$true] %s32_s22  ;;  %s21_s24 = int_to_ptr.vmem [resolvable:$true] %s20_s24 }
   0x4   :  { %s1211_s25 = scalar_lea.vmem %s33_s22, 512  ;;  %p1216_p1 = scmp.lt.s32.totalorder %s33_s22, %s33_s22 }
   0x5   :  { %p1212_p0 = scmp.ne.s32.totalorder %s33_s22, %s1211_s25  ;;  %p1217_p2 = scmp.lt.s32.totalorder %s1211_s25, %s1211_s25 }
   0x7   :  { %p1218_p3 = por %p1217_p2, %p1216_p1 }
   0x9   :  { %p1219_p4 = pnand %p1218_p3, %p1212_p0 }
   0xb   :  { %1222 = shalt.err (!%p1219_p4)
}
   0xc   :  { %s1291_s26 = smov 128   ;;  %s1292_s27 = smov 8  }
   0xd   :  { %38 = dma.hbm_to_vmem [thread:$0]  %s1464_s1, 512, %s33_s22, [#allocation7], %s1291_s26, %s1291_s26, %s1292_s27  }
   0xe   :  { %s1231_s30 = scalar_lea.vmem %s21_s24, 256  ;;  %p1236_p6 = scmp.lt.s32.totalorder %s21_s24, %s21_s24 }
   0xf   :  { %p1232_p5 = scmp.ne.s32.totalorder %s21_s24, %s1231_s30  ;;  %p1237_p7 = scmp.lt.s32.totalorder %s1231_s30, %s1231_s30 }
  0x11   :  { %p1238_p8 = por %p1237_p7, %p1236_p6 }
  0x13   :  { %p1239_p9 = pnand %p1238_p8, %p1232_p5 }
  0x15   :  { %1242 = shalt.err (!%p1239_p9)
}
  0x16   :  { %26 = dma.hbm_to_vmem [thread:$0]  %s1463_s0, 256, %s21_s24, [#allocation4], %s1291_s26, %s1291_s26, %s1292_s27  }
  0x17   :  { %s1293_s9 = smov [#allocation8]  }
  0x18   :  { %s46_s10 = sshll.u32 %s1293_s9, 4  ;;  %s47_s10 = int_to_ptr.vmem [resolvable:$true] %s46_s10 }
  0x19   :  { %s1251_s11 = scalar_lea.vmem %s47_s10, 1024  ;;  %p1256_p11 = scmp.lt.s32.totalorder %s47_s10, %s47_s10 }
  0x1a   :  { %p1252_p10 = scmp.ne.s32.totalorder %s47_s10, %s1251_s11  ;;  %p1257_p12 = scmp.lt.s32.totalorder %s1251_s11, %s1251_s11 }
  0x1c   :  { %p1258_p13 = por %p1257_p12, %p1256_p11 }
  0x1e   :  { %p1259_p0 = pnand %p1258_p13, %p1252_p10 }
  0x20   :  { %1262 = shalt.err (!%p1259_p0)
}
  0x21   :  { %52 = dma.hbm_to_vmem [thread:$0]  %s1466_s3, 1024, %s47_s10, [#allocation7], %s1291_s26, %s1291_s26, %s1292_s27  }
  0x22   :  { %1283 = dma.done.wait [#allocation4], 256  }
  0x23   :  { %1284 = vsyncadd [#allocation4], 4294967040 }
  0x24   :  { %1285 = dma.done.wait [#allocation7], 1536  }
  0x25   :  { %1286 = vsyncadd [#allocation7], 4294965760  ;;  %v1351_v0 = vld [vmem:[#allocation3] sm:$0xff]  ;;  %v220_v1 = vld [vmem:[#allocation6 + $0x8] sm:$0xff]  ;;  %s1294_s0 = smov 120   ;;  %vm73_vm0 = vcmask 64512   ;;  %v1381_v36 = vstv %s1468_s5 }
  0x26   :  { %237 = vrot.lane.b32.xlu0 %v1351_v0, %s1294_s0  ;;  %v1356_v2 = vmul.f32 %v1351_v0, %v1351_v0  ;;  %1103 = vmatprep.subr.mxu1 %v220_v1  ;;  %v1358_v3 = vld [vmem:[#allocation3 + $0x8] sm:$0xff]  ;;  %s1295_s3 = smov 112   ;;  %v1052_v11 = vld [vmem:[%s1465_s2 + $0x1] ss:$0 sm:$0xff]  ;;  %vm194_vm5 = vcmask 130048   ;;  %v69_v41 = vld [vmem:[#allocation6] sm:$0xff] }
  0x27   :  { %1104 = vmatpush3.msra.mxu1 %v220_v1  ;;  %1100 = vmatprep.mubr.msk.f32.mxu0 %vm73_vm0, %v1351_v0  ;;  %v1365_v4 = vmul.f32 %v1358_v3, %v1358_v3  ;;  %v376_v52 = vld [vmem:[#allocation8 + $0x18] sm:$0xff]  ;;  %s1296_s5 = smov 104   ;;  %v375_v53 = vld [vmem:[#allocation8 + $0x10] sm:$0xff]  ;;  %s1297_s24 = smov [#allocation9]  }
  0x28   :  { %225 = vrot.lane.b32.xlu1 %v1356_v2, %s1294_s0  ;;  %1098 = vmatprep.subr.mxu0 %v69_v41  ;;  %v540_v54 = vld [vmem:[#allocation6 + $0x10] sm:$0xff]  ;;  %v74_v56 = vsel %vm73_vm0, %v1356_v2, 0.0  ;;  %s1033_s25 = sshll.u32 %s1297_s24, 4  ;;  %s1034_s25 = int_to_ptr.vmem [resolvable:$true] %s1033_s25 }
  0x29   :  { %1099 = vmatpush3.msra.mxu0 %v69_v41  ;;  %v77_v55 = vsel %vm73_vm0, %v1365_v4, 0.0  ;;  %s1263_s28 = scalar_lea.vmem %s1034_s25, 256  ;;  %p1268_p2 = scmp.lt.s32.totalorder %s1034_s25, %s1034_s25 }
  0x2a   :  { %239 = vrot.lane.b32.xlu0 %v1358_v3, %s1294_s0  ;;  %1101 = vmatmul.mubr.msk.f32.vlgmr.msra.gmra.mxu0 %vm73_vm0, %v1358_v3  ;;  %p1264_p1 = scmp.ne.s32.totalorder %s1034_s25, %s1263_s28  ;;  %p1269_p3 = scmp.lt.s32.totalorder %s1263_s28, %s1263_s28 }
  0x2b   :  { %1108 = vmatprep.subr.mxu0 %v376_v52 }
  0x2c   :  { %227 = vrot.lane.b32.xlu1 %v1365_v4, %s1294_s0  ;;  %1109 = vmatpush3.msra.mxu0 %v376_v52  ;;  %p1270_p4 = por %p1269_p3, %p1268_p2 }
  0x2d   :  { %1110 = vmatprep.subr.mxu0 %v375_v53 }
  0x2e   :  { %1111 = vmatpush3.msra.mxu0 %v375_v53  ;;  %p1271_p5 = pnand %p1270_p4, %p1264_p1 }
  0x2f   :  { %1122 = vmatprep.subr.mxu0 %v540_v54 }
  0x98   :  { %v238_v5 = vpop.permute.xlu0 %237 }
  0x99   :  { %1105 = vmatprep.mubr.msk.f32.mxu1 %vm73_vm0, %v238_v5 }
  0x9a   :  { %v226_v6 = vpop.permute.xlu1 %225 }
  0x9b   :  { %v231_v7 = vsel %vm73_vm0, %v226_v6, 0.0 }
  0x9c   :  { %v240_v8 = vpop.permute.xlu0 %239  ;;  %232 = vadd.xlane.f32.xlu0 %v231_v7 }
  0x9d   :  { %1106 = vmatmul.mubr.msk.f32.vlgmr.msra.gmra.mxu1 %vm73_vm0, %v240_v8 }
  0x9e   :  { %v228_v9 = vpop.permute.xlu1 %227 }
  0x9f   :  { %v234_v10 = vsel %vm73_vm0, %v228_v9, 0.0 }
  0xa0   :  { %235 = vadd.xlane.f32.xlu1 %v234_v10  ;;  %v779_v10 = vld [vmem:[#allocation6 + $0x18] sm:$0xff] }
  0xb1   :  { %555 = vrot.lane.b32.xlu1 %v1351_v0, %s1295_s3 }
 0x125   :  { %v233_v13 = vpop.xlane.xlu0 %232 }
 0x126   :  { %v326_v17 = vadd.f32 %v1052_v11, %v233_v13 }
 0x129   :  { %v236_v12 = vpop.xlane.xlu1 %235 }
 0x12a   :  { %v327_v14 = vadd.f32 %v1052_v11, %v236_v12  ;;  %v1102_v12 = vpop.f32.mrf.mxu0 }
 0x12c   :  { %v152_v13 = vpop.f32.mrf.mxu0 }
 0x12d   :  { %v556_v57 = vpop.permute.xlu1 %555 }
 0x15d   :  { %v1107_v15 = vpop.f32.mrf.mxu1 }
 0x15e   :  { %v329_v16 = vmul.f32 2.0, %v1107_v15  ;;  %v170_v15 = vmul.f32 2.0, %v1102_v12 }
 0x15f   :  { %v311_v18 = vpop.f32.mrf.mxu1 }
 0x160   :  { %v331_v19 = vsub.f32 %v327_v14, %v329_v16  ;;  %v328_v20 = vmul.f32 2.0, %v311_v18  ;;  %v1048_v14 = vld [vmem:[%s1465_s2] ss:$0 sm:$0xff]  ;;  %v169_v16 = vmul.f32 2.0, %v152_v13 }
 0x162   :  { %v333_v21 = vmax.f32 %v331_v19, 0.0  ;;  %v330_v22 = vsub.f32 %v326_v17, %v328_v20 }
 0x164   :  { %1155 = vrsqrt.f32 %v333_v21  ;;  %v332_v23 = vmax.f32 %v330_v22, 0.0  ;;  %vm343_vm1 = vcmp.eq.f32.partialorder %v333_v21, inf  ;;  %v346_v27 = vand.u32 2147483648, %v333_v21 }
 0x165   :  { %vm345_vm2 = vcmp.eq.f32.partialorder %v333_v21, 0.0 }
 0x166   :  { %1157 = vrsqrt.f32 %v332_v23  ;;  %vm336_vm3 = vcmp.eq.f32.partialorder %v332_v23, inf  ;;  %v339_v30 = vand.u32 2147483648, %v332_v23  ;;  %vm338_vm4 = vcmp.eq.f32.partialorder %v332_v23, 0.0 }
 0x171   :  { %v1156_v24 = vpop.eup %1155 }
 0x172   :  { %v342_v25 = vmul.f32 %v1156_v24, %v333_v21 }
 0x173   :  { %v1158_v26 = vpop.eup %1157 }
 0x174   :  { %v335_v28 = vmul.f32 %v1158_v26, %v332_v23  ;;  %v344_v29 = vsel %vm343_vm1, %v333_v21, %v342_v25 }
 0x175   :  { %v347_v31 = vsel %vm345_vm2, %v346_v27, %v344_v29 }
 0x176   :  { %v337_v32 = vsel %vm336_vm3, %v332_v23, %v335_v28  ;;  %v349_v35 = vsub.f32 0.0, %v347_v31 }
 0x177   :  { %v340_v33 = vsel %vm338_vm4, %v339_v30, %v337_v32 }
 0x178   :  { %v348_v34 = vsub.f32 0.0, %v340_v33  ;;  %v351_v39 = vmul.f32 %v349_v35, %v1381_v36 }
 0x17a   :  { %v350_v37 = vmul.f32 %v348_v34, %v1381_v36  ;;  %v355_v40 = vsel %vm194_vm5, %v351_v39, -inf }
 0x17c   :  { %v352_v38 = vsel %vm194_vm5, %v350_v37, -inf }
 0x17d   :  { %353 = vmax.xlane.f32.xlu0 %v352_v38 }
 0x181   :  { %356 = vmax.xlane.f32.xlu0 %v355_v40 }
 0x206   :  { %v354_v42 = vpop.xlane.xlu0 %353 }
 0x207   :  { %v358_v43 = vsub.f32 %v350_v37, %v354_v42 }
 0x209   :  { %v360_v44 = vmul.f32 1.442695, %v358_v43 }
 0x20a   :  { %v357_v45 = vpop.xlane.xlu0 %356 }
 0x20b   :  { %1159 = vpow2.f32 %v360_v44  ;;  %v359_v46 = vsub.f32 %v351_v39, %v357_v45  ;;  %v1060_v45 = vld [vmem:[%s1465_s2 + $0x2] ss:$0 sm:$0xff] }
 0x20d   :  { %v362_v47 = vmul.f32 1.442695, %v359_v46 }
 0x20f   :  { %1161 = vpow2.f32 %v362_v47 }
 0x218   :  { %v1160_v48 = vpop.eup %1159 }
 0x219   :  { %v364_v49 = vsel %vm194_vm5, %v1160_v48, 0.0 }
 0x21a   :  { %365 = vadd.xlane.f32.xlu1 %v364_v49  ;;  %v1066_v49 = vld [vmem:[%s1465_s2 + $0x3] ss:$0 sm:$0xff] }
 0x21c   :  { %v1162_v50 = vpop.eup %1161 }
 0x21d   :  { %v367_v51 = vsel %vm194_vm5, %v1162_v50, 0.0 }
 0x21e   :  { %368 = vadd.xlane.f32.xlu0 %v367_v51 }
 0x22b   :  { %794 = vrot.lane.b32.xlu1 %v1351_v0, %s1296_s5 }
 0x22f   :  { %796 = vrot.lane.b32.xlu1 %v1358_v3, %s1296_s5 }
 0x233   :  { %545 = vrot.lane.b32.xlu1 %v1365_v4, %s1295_s3 }
 0x234   :  { %557 = vrot.lane.b32.xlu0 %v1358_v3, %s1295_s3 }
 0x237   :  { %784 = vrot.lane.b32.xlu1 %v1365_v4, %s1296_s5 }
 0x238   :  { %543 = vrot.lane.b32.xlu0 %v1356_v2, %s1295_s3 }
 0x23c   :  { %782 = vrot.lane.b32.xlu0 %v1356_v2, %s1296_s5 }
 0x25b   :  { %78 = vadd.xlane.f32.xlu1 %v77_v55  ;;  %75 = vadd.xlane.f32.xlu0 %v74_v56 }
 0x2a3   :  { %v366_v58 = vpop.xlane.xlu1 %365 }
 0x2a4   :  { %1163 = vrcp.f32 %v366_v58 }
 0x2a7   :  { %v369_v59 = vpop.xlane.xlu0 %368  ;;  %v795_v60 = vpop.permute.xlu1 %794 }
 0x2a8   :  { %1165 = vrcp.f32 %v369_v59 }
 0x2ab   :  { %v558_v61 = vpop.permute.xlu0 %557  ;;  %v797_v62 = vpop.permute.xlu1 %796 }
 0x2af   :  { %v544_v63 = vpop.permute.xlu0 %543  ;;  %v546_v0 = vpop.permute.xlu1 %545 }
 0x2b0   :  { %v549_v1 = vsel %vm73_vm0, %v544_v63, 0.0  ;;  %v552_v5 = vsel %vm73_vm0, %v546_v0, 0.0 }
 0x2b1   :  { %v1164_v3 = vpop.eup %1163  ;;  %550 = vadd.xlane.f32.xlu0 %v549_v1 }
 0x2b2   :  { %v371_v4 = vmul.f32 %v1164_v3, %v1160_v48 }
 0x2b3   :  { %v783_v2 = vpop.permute.xlu0 %782  ;;  %v785_v9 = vpop.permute.xlu1 %784 }
 0x2b4   :  { %1112 = vmatprep.mubr.msk.f32.mxu0 %vm194_vm5, %v371_v4  ;;  %v788_v6 = vsel %vm73_vm0, %v783_v2, 0.0  ;;  %v791_v11 = vsel %vm73_vm0, %v785_v9, 0.0 }
 0x2b5   :  { %v1166_v7 = vpop.eup %1165  ;;  %553 = vadd.xlane.f32.xlu0 %v552_v5  ;;  %789 = vadd.xlane.f32.xlu1 %v788_v6 }
 0x2b6   :  { %v373_v8 = vmul.f32 %v1166_v7, %v1162_v50 }
 0x2b8   :  { %1113 = vmatmul.mubr.msk.f32.vlgmr.msra.gmra.mxu0 %vm194_vm5, %v373_v8 }
 0x2b9   :  { %1123 = vmatpush3.msra.mxu0 %v540_v54  ;;  %1124 = vmatprep.mubr.msk.f32.mxu0 %vm73_vm0, %v556_v57 }
 0x2ba   :  { %1134 = vmatprep.subr.mxu0 %v779_v10  ;;  %792 = vadd.xlane.f32.xlu0 %v791_v11 }
 0x2bc   :  { %1125 = vmatmul.mubr.msk.f32.vlgmr.msra.gmra.mxu0 %vm73_vm0, %v558_v61 }
 0x2bd   :  { %1135 = vmatpush3.msra.mxu0 %v779_v10  ;;  %1136 = vmatprep.mubr.msk.f32.mxu0 %vm73_vm0, %v795_v60 }
 0x2c0   :  { %1137 = vmatmul.mubr.msk.f32.vlgmr.msra.gmra.mxu0 %vm73_vm0, %v797_v62 }
 0x2e4   :  { %v79_v17 = vpop.xlane.xlu1 %78  ;;  %v76_v18 = vpop.xlane.xlu0 %75 }
 0x2e5   :  { %v168_v19 = vadd.f32 %v1048_v14, %v79_v17  ;;  %v167_v20 = vadd.f32 %v1048_v14, %v76_v18 }
 0x2e7   :  { %v172_v21 = vsub.f32 %v168_v19, %v170_v15  ;;  %v171_v22 = vsub.f32 %v167_v20, %v169_v16 }
 0x2e9   :  { %v174_v23 = vmax.f32 %v172_v21, 0.0  ;;  %v173_v24 = vmax.f32 %v171_v22, 0.0 }
 0x2eb   :  { %1167 = vrsqrt.f32 %v174_v23  ;;  %vm184_vm6 = vcmp.eq.f32.partialorder %v174_v23, inf  ;;  %v187_v26 = vand.u32 2147483648, %v174_v23  ;;  %vm186_vm7 = vcmp.eq.f32.partialorder %v174_v23, 0.0 }
 0x2ec   :  { %1169 = vrsqrt.f32 %v173_v24  ;;  %vm177_vm8 = vcmp.eq.f32.partialorder %v173_v24, inf  ;;  %v180_v29 = vand.u32 2147483648, %v173_v24  ;;  %vm179_vm9 = vcmp.eq.f32.partialorder %v173_v24, 0.0 }
 0x2f8   :  { %v1168_v25 = vpop.eup %1167 }
 0x2f9   :  { %v1170_v27 = vpop.eup %1169  ;;  %v183_v28 = vmul.f32 %v1168_v25, %v174_v23 }
 0x2fa   :  { %v176_v30 = vmul.f32 %v1170_v27, %v173_v24 }
 0x2fb   :  { %v185_v31 = vsel %vm184_vm6, %v174_v23, %v183_v28 }
 0x2fc   :  { %v188_v32 = vsel %vm186_vm7, %v187_v26, %v185_v31  ;;  %v178_v33 = vsel %vm177_vm8, %v173_v24, %v176_v30 }
 0x2fd   :  { %v190_v34 = vsub.f32 0.0, %v188_v32  ;;  %v181_v35 = vsel %vm179_vm9, %v180_v29, %v178_v33 }
 0x2fe   :  { %v189_v37 = vsub.f32 0.0, %v181_v35 }
 0x2ff   :  { %v193_v38 = vmul.f32 %v1381_v36, %v190_v34 }
 0x300   :  { %v192_v39 = vmul.f32 %v1381_v36, %v189_v37 }
 0x301   :  { %v198_v40 = vsel %vm194_vm5, %v193_v38, -inf }
 0x302   :  { %199 = vmax.xlane.f32.xlu0 %v198_v40  ;;  %v195_v41 = vsel %vm194_vm5, %v192_v39, -inf }
 0x303   :  { %196 = vmax.xlane.f32.xlu1 %v195_v41 }
 0x33a   :  { %v551_v42 = vpop.xlane.xlu0 %550 }
 0x33b   :  { %v644_v54 = vadd.f32 %v1060_v45, %v551_v42 }
 0x33e   :  { %v554_v43 = vpop.xlane.xlu0 %553  ;;  %v790_v53 = vpop.xlane.xlu1 %789 }
 0x33f   :  { %v645_v47 = vadd.f32 %v1060_v45, %v554_v43  ;;  %v883_v62 = vadd.f32 %v1066_v49, %v790_v53 }
 0x343   :  { %v793_v50 = vpop.xlane.xlu0 %792 }
 0x344   :  { %v884_v57 = vadd.f32 %v1066_v49, %v793_v50 }
 0x378   :  { %v1422_v44 = vpop.f32.mrf.mxu0 }
 0x37a   :  { %v1427_v46 = vpop.f32.mrf.mxu0 }
 0x37c   :  { %v1126_v48 = vpop.f32.mrf.mxu0 }
 0x37d   :  { %v647_v51 = vmul.f32 2.0, %v1126_v48 }
 0x37e   :  { %v629_v52 = vpop.f32.mrf.mxu0 }
 0x37f   :  { %v649_v55 = vsub.f32 %v645_v47, %v647_v51  ;;  %v646_v56 = vmul.f32 2.0, %v629_v52  ;;  %v218_v51 = vld [vmem:[#allocation8 + $0x8] sm:$0xff]  ;;  %v217_v52 = vld [vmem:[#allocation8] sm:$0xff] }
 0x380   :  { %v1138_v58 = vpop.f32.mrf.mxu0  ;;  %1115 = vmatprep.subr.mxu1 %v218_v51 }
 0x381   :  { %v651_v59 = vmax.f32 %v649_v55, 0.0  ;;  %v648_v60 = vsub.f32 %v644_v54, %v646_v56  ;;  %v886_v61 = vmul.f32 2.0, %v1138_v58  ;;  %1116 = vmatpush3.msra.mxu1 %v218_v51 }
 0x382   :  { %v868_v63 = vpop.f32.mrf.mxu0  ;;  %1117 = vmatprep.subr.mxu1 %v217_v52 }
 0x383   :  { %1171 = vrsqrt.f32 %v651_v59  ;;  %v650_v0 = vmax.f32 %v648_v60, 0.0  ;;  %v888_v1 = vsub.f32 %v884_v57, %v886_v61  ;;  %v885_v3 = vmul.f32 2.0, %v868_v63  ;;  %1118 = vmatpush3.msra.mxu1 %v217_v52 }
 0x384   :  { %vm661_vm10 = vcmp.eq.f32.partialorder %v651_v59, inf  ;;  %v664_v15 = vand.u32 2147483648, %v651_v59  ;;  %vm663_vm11 = vcmp.eq.f32.partialorder %v651_v59, 0.0 }
 0x385   :  { %1173 = vrsqrt.f32 %v650_v0  ;;  %v890_v4 = vmax.f32 %v888_v1, 0.0  ;;  %v887_v5 = vsub.f32 %v883_v62, %v885_v3  ;;  %vm654_vm12 = vcmp.eq.f32.partialorder %v650_v0, inf }
 0x386   :  { %v657_v20 = vand.u32 2147483648, %v650_v0  ;;  %vm656_vm13 = vcmp.eq.f32.partialorder %v650_v0, 0.0 }
 0x387   :  { %1175 = vrsqrt.f32 %v890_v4  ;;  %v889_v2 = vmax.f32 %v887_v5, 0.0  ;;  %vm900_vm14 = vcmp.eq.f32.partialorder %v890_v4, inf  ;;  %vm902_vm15 = vcmp.eq.f32.partialorder %v890_v4, 0.0 }
 0x388   :  { %v903_v26 = vand.u32 2147483648, %v890_v4 }
 0x389   :  { %1177 = vrsqrt.f32 %v889_v2  ;;  %vm893_vm0 = vcmp.eq.f32.partialorder %v889_v2, inf  ;;  %vm895_vm1 = vcmp.eq.f32.partialorder %v889_v2, 0.0  ;;  %v896_v32 = vand.u32 2147483648, %v889_v2 }
 0x38b   :  { %v200_v6 = vpop.xlane.xlu0 %199 }
 0x38c   :  { %v197_v7 = vpop.xlane.xlu1 %196  ;;  %v202_v8 = vsub.f32 %v193_v38, %v200_v6 }
 0x38d   :  { %v201_v9 = vsub.f32 %v192_v39, %v197_v7 }
 0x38e   :  { %v205_v10 = vmul.f32 1.442695, %v202_v8 }
 0x38f   :  { %v203_v11 = vmul.f32 1.442695, %v201_v9 }
 0x390   :  { %v1172_v12 = vpop.eup %1171  ;;  %1179 = vpow2.f32 %v205_v10 }
 0x391   :  { %v660_v13 = vmul.f32 %v1172_v12, %v651_v59  ;;  %1181 = vpow2.f32 %v203_v11 }
 0x392   :  { %v1174_v14 = vpop.eup %1173 }
 0x393   :  { %v662_v16 = vsel %vm661_vm10, %v651_v59, %v660_v13  ;;  %v653_v17 = vmul.f32 %v1174_v14, %v650_v0  ;;  %v694_v14 = vld [vmem:[#allocation8 + $0x28] sm:$0xff] }
 0x394   :  { %v1176_v18 = vpop.eup %1175  ;;  %v665_v19 = vsel %vm663_vm11, %v664_v15, %v662_v16  ;;  %v693_v15 = vld [vmem:[#allocation8 + $0x20] sm:$0xff]  ;;  %1127 = vmatprep.subr.mxu1 %v694_v14  ;;  %v933_v16 = vld [vmem:[#allocation8 + $0x38] sm:$0xff] }
 0x395   :  { %v667_v21 = vsub.f32 0.0, %v665_v19  ;;  %v655_v22 = vsel %vm654_vm12, %v650_v0, %v653_v17  ;;  %v899_v23 = vmul.f32 %v1176_v18, %v890_v4 }
 0x396   :  { %v1178_v24 = vpop.eup %1177  ;;  %v658_v25 = vsel %vm656_vm13, %v657_v20, %v655_v22 }
 0x397   :  { %v669_v27 = vmul.f32 %v667_v21, %v1381_v36  ;;  %v666_v28 = vsub.f32 0.0, %v658_v25  ;;  %v901_v29 = vsel %vm900_vm14, %v890_v4, %v899_v23  ;;  %v892_v30 = vmul.f32 %v1178_v24, %v889_v2 }
 0x398   :  { %v904_v31 = vsel %vm902_vm15, %v903_v26, %v901_v29  ;;  %v932_v26 = vld [vmem:[#allocation8 + $0x30] sm:$0xff] }
 0x399   :  { %v673_v33 = vsel %vm194_vm5, %v669_v27, -inf  ;;  %v668_v34 = vmul.f32 %v666_v28, %v1381_v36  ;;  %v906_v35 = vsub.f32 0.0, %v904_v31  ;;  %v894_v37 = vsel %vm893_vm0, %v889_v2, %v892_v30 }
 0x39a   :  { %674 = vmax.xlane.f32.xlu0 %v673_v33  ;;  %v897_v38 = vsel %vm895_vm1, %v896_v32, %v894_v37 }
 0x39b   :  { %v670_v39 = vsel %vm194_vm5, %v668_v34, -inf  ;;  %v908_v40 = vmul.f32 %v906_v35, %v1381_v36  ;;  %v905_v41 = vsub.f32 0.0, %v897_v38 }
 0x39c   :  { %671 = vmax.xlane.f32.xlu1 %v670_v39  ;;  %v1069_v39 = vld [vmem:[%s1467_s4] ss:$0 sm:$0xff] }
 0x39d   :  { %v912_v42 = vsel %vm194_vm5, %v908_v40, -inf  ;;  %v907_v43 = vmul.f32 %v905_v41, %v1381_v36  ;;  %v1180_v45 = vpop.eup %1179 }
 0x39e   :  { %913 = vmax.xlane.f32.xlu0 %v912_v42  ;;  %v1182_v48 = vpop.eup %1181  ;;  %v210_v49 = vsel %vm194_vm5, %v1180_v45, 0.0 }
 0x39f   :  { %v909_v47 = vsel %vm194_vm5, %v907_v43, -inf  ;;  %v207_v50 = vsel %vm194_vm5, %v1182_v48, 0.0 }
 0x3a0   :  { %910 = vmax.xlane.f32.xlu1 %v909_v47 }
 0x3a2   :  { %211 = vadd.xlane.f32.xlu0 %v210_v49 }
 0x3a4   :  { %208 = vadd.xlane.f32.xlu1 %v207_v50 }
 0x423   :  { %v675_v53 = vpop.xlane.xlu0 %674 }
 0x424   :  { %v677_v36 = vsub.f32 %v669_v27, %v675_v53 }
 0x425   :  { %v672_v54 = vpop.xlane.xlu1 %671 }
 0x426   :  { %v680_v55 = vmul.f32 1.442695, %v677_v36  ;;  %v676_v56 = vsub.f32 %v668_v34, %v672_v54 }
 0x427   :  { %v914_v57 = vpop.xlane.xlu0 %913 }
 0x428   :  { %1183 = vpow2.f32 %v680_v55  ;;  %v678_v58 = vmul.f32 1.442695, %v676_v56  ;;  %v916_v59 = vsub.f32 %v908_v40, %v914_v57 }
 0x429   :  { %v911_v60 = vpop.xlane.xlu1 %910 }
 0x42a   :  { %1185 = vpow2.f32 %v678_v58  ;;  %v919_v61 = vmul.f32 1.442695, %v916_v59  ;;  %v915_v62 = vsub.f32 %v907_v43, %v911_v60 }
 0x42b   :  { %v212_v63 = vpop.xlane.xlu0 %211 }
 0x42c   :  { %1187 = vpow2.f32 %v919_v61  ;;  %v917_v0 = vmul.f32 1.442695, %v915_v62 }
 0x42d   :  { %1189 = vrcp.f32 %v212_v63  ;;  %v209_v1 = vpop.xlane.xlu1 %208 }
 0x42e   :  { %1191 = vpow2.f32 %v917_v0 }
 0x42f   :  { %1193 = vrcp.f32 %v209_v1 }
 0x435   :  { %v1184_v3 = vpop.eup %1183 }
 0x436   :  { %v685_v4 = vsel %vm194_vm5, %v1184_v3, 0.0 }
 0x437   :  { %v1186_v5 = vpop.eup %1185  ;;  %686 = vadd.xlane.f32.xlu0 %v685_v4 }
 0x438   :  { %v682_v2 = vsel %vm194_vm5, %v1186_v5, 0.0 }
 0x439   :  { %v1188_v6 = vpop.eup %1187  ;;  %683 = vadd.xlane.f32.xlu1 %v682_v2 }
 0x43a   :  { %v1190_v7 = vpop.eup %1189  ;;  %v924_v8 = vsel %vm194_vm5, %v1188_v6, 0.0 }
 0x43b   :  { %v1192_v9 = vpop.eup %1191  ;;  %925 = vadd.xlane.f32.xlu0 %v924_v8  ;;  %v216_v13 = vmul.f32 %v1190_v7, %v1180_v45 }
 0x43c   :  { %v1194_v10 = vpop.eup %1193  ;;  %v921_v11 = vsel %vm194_vm5, %v1192_v9, 0.0 }
 0x43d   :  { %922 = vadd.xlane.f32.xlu1 %v921_v11  ;;  %v214_v12 = vmul.f32 %v1194_v10, %v1182_v48 }
 0x43f   :  { %1119 = vmatprep.mubr.msk.f32.mxu1 %vm194_vm5, %v214_v12 }
 0x440   :  { %1120 = vmatmul.mubr.msk.f32.vlgmr.msra.gmra.mxu1 %vm194_vm5, %v216_v13 }
 0x441   :  { %1128 = vmatpush3.msra.mxu1 %v694_v14 }
 0x442   :  { %1129 = vmatprep.subr.mxu1 %v693_v15 }
 0x443   :  { %1130 = vmatpush3.msra.mxu1 %v693_v15 }
 0x444   :  { %1139 = vmatprep.subr.mxu1 %v933_v16 }
 0x4c0   :  { %v687_v17 = vpop.xlane.xlu0 %686 }
 0x4c1   :  { %1195 = vrcp.f32 %v687_v17 }
 0x4c2   :  { %v684_v18 = vpop.xlane.xlu1 %683 }
 0x4c3   :  { %1197 = vrcp.f32 %v684_v18 }
 0x4c4   :  { %v926_v19 = vpop.xlane.xlu0 %925 }
 0x4c5   :  { %1199 = vrcp.f32 %v926_v19 }
 0x4c6   :  { %v923_v20 = vpop.xlane.xlu1 %922 }
 0x4c7   :  { %1201 = vrcp.f32 %v923_v20 }
 0x4ce   :  { %v1196_v21 = vpop.eup %1195 }
 0x4cf   :  { %v691_v24 = vmul.f32 %v1196_v21, %v1184_v3 }
 0x4d0   :  { %v1198_v22 = vpop.eup %1197 }
 0x4d1   :  { %v689_v23 = vmul.f32 %v1198_v22, %v1186_v5 }
 0x4d2   :  { %v1200_v25 = vpop.eup %1199 }
 0x4d3   :  { %1131 = vmatprep.mubr.msk.f32.mxu1 %vm194_vm5, %v689_v23  ;;  %v930_v29 = vmul.f32 %v1200_v25, %v1188_v6 }
 0x4d4   :  { %v1202_v27 = vpop.eup %1201  ;;  %1132 = vmatmul.mubr.msk.f32.vlgmr.msra.gmra.mxu1 %vm194_vm5, %v691_v24 }
 0x4d5   :  { %1140 = vmatpush3.msra.mxu1 %v933_v16  ;;  %v928_v28 = vmul.f32 %v1202_v27, %v1192_v9 }
 0x4d6   :  { %1141 = vmatprep.subr.mxu1 %v932_v26 }
 0x4d7   :  { %1142 = vmatpush3.msra.mxu1 %v932_v26  ;;  %1143 = vmatprep.mubr.msk.f32.mxu1 %vm194_vm5, %v928_v28 }
 0x4d8   :  { %1144 = vmatmul.mubr.msk.f32.vlgmr.msra.gmra.mxu1 %vm194_vm5, %v930_v29 }
 0x500   :  { %v1121_v30 = vpop.f32.mrf.mxu1 }
 0x501   :  { %v536_v33 = vadd.f32 %v1121_v30, %v1422_v44 }
 0x502   :  { %v530_v31 = vpop.f32.mrf.mxu1 }
 0x503   :  { %v531_v35 = vadd.f32 %v530_v31, %v1427_v46 }
 0x594   :  { %v1133_v32 = vpop.f32.mrf.mxu1 }
 0x595   :  { %v777_v37 = vadd.f32 %v1133_v32, %v536_v33 }
 0x596   :  { %v767_v34 = vpop.f32.mrf.mxu1 }
 0x597   :  { %v776_v40 = vadd.f32 %v767_v34, %v531_v35 }
 0x598   :  { %v1145_v38 = vpop.f32.mrf.mxu1 }
 0x599   :  { %v1016_v41 = vadd.f32 %v1145_v38, %v777_v37 }
 0x59a   :  { %v1006_v42 = vpop.f32.mrf.mxu1 }
 0x59b   :  { %v1025_v43 = vadd.f32 %v1069_v39, %v1016_v41  ;;  %v1015_v45 = vadd.f32 %v1006_v42, %v776_v40 }
 0x59d   :  { %1027 = vst [vmem:[#allocation9 + $0x8] sm:$0xff] %v1025_v43  ;;  %v1024_v47 = vadd.f32 %v1069_v39, %v1015_v45 }
 0x59f   :  { %1026 = vst [vmem:[#allocation9] sm:$0xff] %v1024_v47 }
 0x5a0   :  { %1274 = shalt.err (!%p1271_p5)
}
 0x5a1   :  { %1039 = dma.vmem_to_hbm [thread:$0]  %s1034_s25, 256, %s1469_s6, [#allocation5], %s1291_s26, %s1291_s26, %s1292_s27  }
 0x5a2   :  { %1287 = dma.done.wait [#allocation5], 256  }
 0x5a3   :  { %1288 = vsyncadd [#allocation5], 4294967040 }
 0x5a4   :  { %1043 = vsyncpa [#allocation4], 1 }
 0x5a5   :  { %1044 = vsyncpa [#allocation7], 1 }
 0x5a6   :  { %1045 = vsyncpa [#allocation5], 1 }

</bundles_post_ra>
